<compile_context>
chip_gen: v5e
topology: v5e:2x2
jax: 0.10.0
libtpu: 0.0.40
codegen_flags: <defaults>
</compile_context>

<pallas_src>
import functools

import jax
import jax.numpy as jnp
from jax.experimental import pallas as pl
from jax.experimental.pallas import tpu as pltpu


def _round_up(a, m):
    return (a + m - 1) // m * m


# ---------------------------------------------------------------------------
# Pass 1: conv-as-matmul + per-tile channel sum / sum-of-squares partials.
# ---------------------------------------------------------------------------
def _conv_stats_kernel(x_ref, w_ref, y_ref, psum_ref, psq_ref):
    # x_ref: (TR, KCp) im2col rows (f32 or bf16)
    # w_ref: (KCp, CP) folded weights (same dtype as x), VMEM-resident across grid
    # y_ref: (TR, CP)  raw conv output (f32)
    # psum_ref / psq_ref: (1, 8, CP) per-tile partial stats (sublane 0 is used)
    acc = jnp.dot(x_ref[...], w_ref[...], preferred_element_type=jnp.float32)
    y_ref[...] = acc
    s = jnp.sum(acc, axis=0, keepdims=True)           # (1, CP)
    sq = jnp.sum(acc * acc, axis=0, keepdims=True)    # (1, CP)
    psum_ref[...] = jnp.broadcast_to(s[None], psum_ref.shape)
    psq_ref[...] = jnp.broadcast_to(sq[None], psq_ref.shape)


# ---------------------------------------------------------------------------
# Pass 2: y * scale + shift, then ReLU (scale/shift precomputed per channel).
# ---------------------------------------------------------------------------
def _bn_relu_kernel(y_ref, scale_ref, shift_ref, o_ref):
    o_ref[...] = jnp.maximum(y_ref[...] * scale_ref[...] + shift_ref[...], 0.0)


def _pick_row_tile(n_rows, kc_pad, c_pad):
    """Largest row tile keeping double-buffered f32 tiles well under VMEM (v7x-safe)."""
    tr = 512
    budget = 8 * 1024 * 1024  # bytes, conservative vs v7x's 64 MiB physical VMEM
    while tr > 8 and 2 * 4 * tr * (kc_pad + 2 * c_pad) > budget:
        tr //= 2
    return max(8, min(tr, _round_up(n_rows, 8)))


@functools.partial(jax.jit, static_argnames=(
    "stride", "dilation", "padding", "eps", "compute_dtype"))
def conv_bn_relu(x, w, b, gamma, beta, *, stride=1, dilation=1, padding=0,
                 eps=1e-5, compute_dtype=jnp.float32):
    """x: (N, C_in, L) NCW, w: (C_out, C_in, K). Returns (N, C_out, L_out) f32."""
    del b  # per-channel conv bias is exactly cancelled by training-mode BN mean subtraction
    N, C_in, L = x.shape
    C_out, _, K = w.shape
    L_out = (L + 2 * padding - dilation * (K - 1) - 1) // stride + 1

    # ---- wrapper glue (XLA): layout, halo padding, im2col, channel padding ----
    # TODO(synk): for production sizes, express the (K-1)*dilation halo via
    # overlapping input blocks in the index_map instead of a materialized im2col.
    x_nlc = jnp.transpose(x, (0, 2, 1)).astype(jnp.float32)          # (N, L, C_in)
    x_pad = jnp.pad(x_nlc, ((0, 0), (padding, padding), (0, 0)))
    tap_idx = (jnp.arange(L_out) * stride)[:, None] + \
              (jnp.arange(K) * dilation)[None, :]                    # (L_out, K)
    cols = x_pad[:, tap_idx, :].reshape(N * L_out, K * C_in)         # (R, K*C_in)

    R = N * L_out
    KC = K * C_in
    KCp = _round_up(KC, 128)        # lane-dense contraction
    CP = _round_up(C_out, 128)      # lane-dense output channels
    TR = _pick_row_tile(R, KCp, CP)
    Rp = _round_up(R, TR)
    G = Rp // TR

    lhs = jnp.zeros((Rp, KCp), compute_dtype).at[:R, :KC].set(
        cols.astype(compute_dtype))
    w_kc = jnp.transpose(w, (2, 1, 0)).reshape(KC, C_out)            # rows = (k, c_in)
    rhs = jnp.zeros((KCp, CP), compute_dtype).at[:KC, :C_out].set(
        w_kc.astype(compute_dtype))

    cparams = pltpu.CompilerParams(dimension_semantics=("parallel",),
                                   vmem_limit_bytes=32 * 1024 * 1024)

    # ---- pass 1: tiled conv matmul + partial stats ----------------------------
    y, psum, psq = pl.pallas_call(
        _conv_stats_kernel,
        out_shape=(jax.ShapeDtypeStruct((Rp, CP), jnp.float32),
                   jax.ShapeDtypeStruct((G, 8, CP), jnp.float32),
                   jax.ShapeDtypeStruct((G, 8, CP), jnp.float32)),
        grid=(G,),
        in_specs=[
            pl.BlockSpec((TR, KCp), lambda i: (i, 0)),
            pl.BlockSpec((KCp, CP), lambda i: (0, 0)),   # same block -> stays resident
        ],
        out_specs=(
            pl.BlockSpec((TR, CP), lambda i: (i, 0)),
            pl.BlockSpec((1, 8, CP), lambda i: (i, 0, 0)),
            pl.BlockSpec((1, 8, CP), lambda i: (i, 0, 0)),
        ),
        compiler_params=cparams,
    )(lhs, rhs)

    # ---- tiny cross-tile reduction + per-channel scale/shift (f32) ------------
    cnt = jnp.float32(R)                 # padded rows are exactly zero -> no bias in stats
    ch_sum = jnp.sum(psum[:, 0, :], axis=0)
    ch_sq = jnp.sum(psq[:, 0, :], axis=0)
    mean = ch_sum / cnt
    var = jnp.maximum(ch_sq / cnt - mean * mean, 0.0)   # f32 accumulators throughout
    gamma_p = jnp.zeros((CP,), jnp.float32).at[:C_out].set(gamma.astype(jnp.float32))
    beta_p = jnp.zeros((CP,), jnp.float32).at[:C_out].set(beta.astype(jnp.float32))
    scale = (gamma_p * jax.lax.rsqrt(var + eps)).reshape(1, CP)
    shift = (beta_p - mean * scale[0]).reshape(1, CP)

    # ---- pass 2: tiled normalize + ReLU ---------------------------------------
    out_rows = pl.pallas_call(
        _bn_relu_kernel,
        out_shape=jax.ShapeDtypeStruct((Rp, CP), jnp.float32),
        grid=(G,),
        in_specs=[
            pl.BlockSpec((TR, CP), lambda i: (i, 0)),
            pl.BlockSpec((1, CP), lambda i: (0, 0)),
            pl.BlockSpec((1, CP), lambda i: (0, 0)),
        ],
        out_specs=pl.BlockSpec((TR, CP), lambda i: (i, 0)),
        compiler_params=cparams,
    )(y, scale, shift)

    out = out_rows[:R, :C_out].reshape(N, L_out, C_out)
    return jnp.transpose(out, (0, 2, 1))                # back to NCW


def reference(x, w, b, gamma, beta, *, stride, dilation, padding, eps=1e-5):
    y = jax.lax.conv_general_dilated(
        x, w, window_strides=(stride,), padding=[(padding, padding)],
        rhs_dilation=(dilation,), dimension_numbers=("NCH", "OIH", "NCH"))
    y = y + b[None, :, None]
    mean = jnp.mean(y, axis=(0, 2), keepdims=True)
    var = jnp.mean((y - mean) ** 2, axis=(0, 2), keepdims=True)
    y = (y - mean) * jax.lax.rsqrt(var + eps)
    y = y * gamma[None, :, None] + beta[None, :, None]
    return jnp.maximum(y, 0.0)


if __name__ == "__main__":
    N, C_in, C_out, L, K = 2, 4, 8, 16, 3

    key = jax.random.PRNGKey(0)
    kx, kw, kb = jax.random.split(key, 3)
    x = jax.random.normal(kx, (N, C_in, L), jnp.float32)
    w = jax.random.normal(kw, (C_out, C_in, K), jnp.float32) * 0.2
    b = jax.random.normal(kb, (C_out,), jnp.float32) * 0.1
    gamma = jnp.ones((C_out,), jnp.float32)   # fresh BatchNorm1d init
    beta = jnp.zeros((C_out,), jnp.float32)

    # f32 path: two conv configurations (plain, and strided/dilated).
    for stride, dilation, padding in [(1, 1, 1), (2, 2, 2)]:
        out = conv_bn_relu(x, w, b, gamma, beta, stride=stride,
                           dilation=dilation, padding=padding)
        jax.block_until_ready(out)
        ref = reference(x, w, b, gamma, beta, stride=stride,
                        dilation=dilation, padding=padding)
        assert out.shape == ref.shape, (out.shape, ref.shape)
        assert jnp.allclose(out, ref, atol=1e-3, rtol=1e-3), \
            f"f32 mismatch (stride={stride}, dilation={dilation}, padding={padding})"

    # bf16 MXU operands (v6e/v7x fast path); f32 accumulation & BN statistics.
    out_bf16 = conv_bn_relu(x, w, b, gamma, beta, stride=1, dilation=1,
                            padding=1, compute_dtype=jnp.bfloat16)
    jax.block_until_ready(out_bf16)
    ref = reference(x, w, b, gamma, beta, stride=1, dilation=1, padding=1)
    assert jnp.allclose(out_bf16, ref, atol=5e-2, rtol=5e-2), "bf16 mismatch"

    print("KERNEL_OK")
</pallas_src>

<mosaic_0001>
module attributes {stable_mosaic.version = 11 : i64} {
  func.func @_conv_stats_kernel(%arg0: i32, %arg1: memref<32x128xf32, #tpu.memory_space<vmem>>, %arg2: memref<128x128xf32, #tpu.memory_space<vmem>>, %arg3: memref<32x128xf32, #tpu.memory_space<vmem>>, %arg4: memref<1x8x128xf32, #tpu.memory_space<vmem>>, %arg5: memref<1x8x128xf32, #tpu.memory_space<vmem>>) attributes {dimension_semantics = [#tpu.dimension_semantics<parallel>], iteration_bounds = array<i64: 1>, scalar_prefetch = 0 : i64, scratch_operands = 0 : i64, tpu.core_type = #tpu.core_type<tc>, window_params = [{transform_indices = @transform_0, window_bounds = array<i64: 32, 128>}, {pipeline_mode = #tpu.pipeline_mode<synchronous>, transform_indices = @transform_1, window_bounds = array<i64: 128, 128>}, {transform_indices = @transform_2, window_bounds = array<i64: 32, 128>}, {transform_indices = @transform_3, window_bounds = array<i64: 1, 8, 128>}, {transform_indices = @transform_4, window_bounds = array<i64: 1, 8, 128>}]} {
    %c0 = arith.constant 0 : index
    %c0_0 = arith.constant 0 : index
    %0 = vector.load %arg1[%c0, %c0_0] : memref<32x128xf32, #tpu.memory_space<vmem>>, vector<32x128xf32>
    %c0_1 = arith.constant 0 : index
    %c0_2 = arith.constant 0 : index
    %1 = vector.load %arg2[%c0_1, %c0_2] : memref<128x128xf32, #tpu.memory_space<vmem>>, vector<128x128xf32>
    %cst = arith.constant dense<0.000000e+00> : vector<32x128xf32>
    %2 = tpu.matmul %0, %1, %cst {dimension_numbers = #tpu.dot_dimension_numbers<[1], [0], [0], [1], [0, 0, 1, 1], [], []>} : vector<32x128xf32>, vector<128x128xf32>, vector<32x128xf32> -> vector<32x128xf32>
    %c0_3 = arith.constant 0 : index
    %c0_4 = arith.constant 0 : index
    %3 = vector.load %arg3[%c0_3, %c0_4] : memref<32x128xf32, #tpu.memory_space<vmem>>, vector<32x128xf32>
    tpu.vector_store %arg3[%c0_3, %c0_4], %2 {strides = array<i32>} : memref<32x128xf32, #tpu.memory_space<vmem>>, vector<32x128xf32>,
    %cst_5 = arith.constant dense<0.000000e+00> : vector<128xf32>
    %4 = vector.multi_reduction <add>, %2, %cst_5 [0] : vector<32x128xf32> to vector<128xf32>
    %5 = vector.shape_cast %4 : vector<128xf32> to vector<1x128xf32>
    %6 = arith.mulf %2, %2 : vector<32x128xf32>
    %cst_6 = arith.constant dense<0.000000e+00> : vector<128xf32>
    %7 = vector.multi_reduction <add>, %6, %cst_6 [0] : vector<32x128xf32> to vector<128xf32>
    %8 = vector.shape_cast %7 : vector<128xf32> to vector<1x128xf32>
    %9 = vector.shape_cast %5 : vector<1x128xf32> to vector<1x1x128xf32>
    %10 = vector.shape_cast %9 : vector<1x1x128xf32> to vector<1x1x128xf32>
    %11 = vector.broadcast %10 : vector<1x1x128xf32> to vector<1x8x128xf32>
    %c0_7 = arith.constant 0 : index
    %c0_8 = arith.constant 0 : index
    %c0_9 = arith.constant 0 : index
    %12 = vector.load %arg4[%c0_7, %c0_8, %c0_9] : memref<1x8x128xf32, #tpu.memory_space<vmem>>, vector<1x8x128xf32>
    tpu.vector_store %arg4[%c0_7, %c0_8, %c0_9], %11 {strides = array<i32>} : memref<1x8x128xf32, #tpu.memory_space<vmem>>, vector<1x8x128xf32>,
    %13 = vector.shape_cast %8 : vector<1x128xf32> to vector<1x1x128xf32>
    %14 = vector.shape_cast %13 : vector<1x1x128xf32> to vector<1x1x128xf32>
    %15 = vector.broadcast %14 : vector<1x1x128xf32> to vector<1x8x128xf32>
    %c0_10 = arith.constant 0 : index
    %c0_11 = arith.constant 0 : index
    %c0_12 = arith.constant 0 : index
    %16 = vector.load %arg5[%c0_10, %c0_11, %c0_12] : memref<1x8x128xf32, #tpu.memory_space<vmem>>, vector<1x8x128xf32>
    tpu.vector_store %arg5[%c0_10, %c0_11, %c0_12], %15 {strides = array<i32>} : memref<1x8x128xf32, #tpu.memory_space<vmem>>, vector<1x8x128xf32>,
    return
  }
  func.func @transform_0(%arg0: i32) -> (i32, i32) {
    %c0_i32 = arith.constant 0 : i32
    %c0_i32_0 = arith.constant 0 : i32
    return %arg0, %c0_i32 : i32, i32
  }
  func.func @transform_1(%arg0: i32) -> (i32, i32) {
    %c0_i32 = arith.constant 0 : i32
    %c0_i32_0 = arith.constant 0 : i32
    %c0_i32_1 = arith.constant 0 : i32
    return %c0_i32, %c0_i32_0 : i32, i32
  }
  func.func @transform_2(%arg0: i32) -> (i32, i32) {
    %c0_i32 = arith.constant 0 : i32
    %c0_i32_0 = arith.constant 0 : i32
    return %arg0, %c0_i32 : i32, i32
  }
  func.func @transform_3(%arg0: i32) -> (i32, i32, i32) {
    %c0_i32 = arith.constant 0 : i32
    %c0_i32_0 = arith.constant 0 : i32
    %c0_i32_1 = arith.constant 0 : i32
    return %arg0, %c0_i32, %c0_i32_0 : i32, i32, i32
  }
  func.func @transform_4(%arg0: i32) -> (i32, i32, i32) {
    %c0_i32 = arith.constant 0 : i32
    %c0_i32_0 = arith.constant 0 : i32
    %c0_i32_1 = arith.constant 0 : i32
    return %arg0, %c0_i32, %c0_i32_0 : i32, i32, i32
  }
}

module attributes {stable_mosaic.version = 11 : i64} {
  func.func @_bn_relu_kernel(%arg0: i32, %arg1: memref<32x128xf32, #tpu.memory_space<vmem>>, %arg2: memref<1x128xf32, #tpu.memory_space<vmem>>, %arg3: memref<1x128xf32, #tpu.memory_space<vmem>>, %arg4: memref<32x128xf32, #tpu.memory_space<vmem>>) attributes {dimension_semantics = [#tpu.dimension_semantics<parallel>], iteration_bounds = array<i64: 1>, scalar_prefetch = 0 : i64, scratch_operands = 0 : i64, tpu.core_type = #tpu.core_type<tc>, window_params = [{transform_indices = @transform_0, window_bounds = array<i64: 32, 128>}, {pipeline_mode = #tpu.pipeline_mode<synchronous>, transform_indices = @transform_1, window_bounds = array<i64: 1, 128>}, {pipeline_mode = #tpu.pipeline_mode<synchronous>, transform_indices = @transform_2, window_bounds = array<i64: 1, 128>}, {transform_indices = @transform_3, window_bounds = array<i64: 32, 128>}]} {
    %c0 = arith.constant 0 : index
    %c0_0 = arith.constant 0 : index
    %0 = vector.load %arg1[%c0, %c0_0] : memref<32x128xf32, #tpu.memory_space<vmem>>, vector<32x128xf32>
    %c0_1 = arith.constant 0 : index
    %c0_2 = arith.constant 0 : index
    %1 = vector.load %arg2[%c0_1, %c0_2] : memref<1x128xf32, #tpu.memory_space<vmem>>, vector<1x128xf32>
    %2 = vector.broadcast %1 : vector<1x128xf32> to vector<32x128xf32>
    %3 = arith.mulf %0, %2 : vector<32x128xf32>
    %c0_3 = arith.constant 0 : index
    %c0_4 = arith.constant 0 : index
    %4 = vector.load %arg3[%c0_3, %c0_4] : memref<1x128xf32, #tpu.memory_space<vmem>>, vector<1x128xf32>
    %5 = vector.broadcast %4 : vector<1x128xf32> to vector<32x128xf32>
    %6 = arith.addf %3, %5 : vector<32x128xf32>
    %cst = arith.constant 0.000000e+00 : f32
    %7 = vector.broadcast %cst : f32 to vector<32x128xf32>
    %8 = arith.maximumf %6, %7 : vector<32x128xf32>
    %c0_5 = arith.constant 0 : index
    %c0_6 = arith.constant 0 : index
    %9 = vector.load %arg4[%c0_5, %c0_6] : memref<32x128xf32, #tpu.memory_space<vmem>>, vector<32x128xf32>
    tpu.vector_store %arg4[%c0_5, %c0_6], %8 {strides = array<i32>} : memref<32x128xf32, #tpu.memory_space<vmem>>, vector<32x128xf32>,
    return
  }
  func.func @transform_0(%arg0: i32) -> (i32, i32) {
    %c0_i32 = arith.constant 0 : i32
    %c0_i32_0 = arith.constant 0 : i32
    return %arg0, %c0_i32 : i32, i32
  }
  func.func @transform_1(%arg0: i32) -> (i32, i32) {
    %c0_i32 = arith.constant 0 : i32
    %c0_i32_0 = arith.constant 0 : i32
    %c0_i32_1 = arith.constant 0 : i32
    return %c0_i32, %c0_i32_0 : i32, i32
  }
  func.func @transform_2(%arg0: i32) -> (i32, i32) {
    %c0_i32 = arith.constant 0 : i32
    %c0_i32_0 = arith.constant 0 : i32
    %c0_i32_1 = arith.constant 0 : i32
    return %c0_i32, %c0_i32_0 : i32, i32
  }
  func.func @transform_3(%arg0: i32) -> (i32, i32) {
    %c0_i32 = arith.constant 0 : i32
    %c0_i32_0 = arith.constant 0 : i32
    return %arg0, %c0_i32 : i32, i32
  }
}

</mosaic_0001>

<bundles_post_ra>
// kernel: conv_bn_relu.3
= control target key start
LH: loop header
LB: loop body
LE: loop exit
PB: predicated region body
PF: predicated region fallthrough
CT: control target
= control target key end

     0   :  { %s98_s0 = inlined_call_operand.vmem [shape: f32[32,128], index: 0, kind: input, shape index: {}]   ;;  %s99_s1 = inlined_call_operand.vmem [shape: f32[1,128], index: 1, kind: input, shape index: {}]   ;;  %s100_s2 = inlined_call_operand.vmem [shape: f32[1,128], index: 2, kind: input, shape index: {}]   ;;  %s101_s3 = inlined_call_operand.vmem [shape: f32[32,128], index: 3, kind: output, shape index: {}]  }
   0x1   :  { %v14_v0 = vld [vmem:[%s98_s0] sm:$0xff]  ;;  %v15_v3 = vld [vmem:[%s98_s0 + $0x8] sm:$0xff]  ;;  %v16_v6 = vld [vmem:[%s98_s0 + $0x10] sm:$0xff] }
   0x2   :  { %v46_v1 = vld [vmem:[%s99_s1] ss:$0 sm:$0xff]  ;;  %v17_v7 = vld [vmem:[%s98_s0 + $0x18] sm:$0xff] }
   0x3   :  { %v47_v2 = vld [vmem:[%s100_s2] ss:$0 sm:$0xff]  ;;  %v22_v4 = vmul.f32 %v46_v1, %v14_v0  ;;  %v23_v5 = vmul.f32 %v46_v1, %v15_v3  ;;  %v24_v8 = vmul.f32 %v46_v1, %v16_v6  ;;  %v25_v9 = vmul.f32 %v46_v1, %v17_v7 }
   0x5   :  { %v30_v10 = vadd.f32 %v47_v2, %v22_v4  ;;  %v31_v11 = vadd.f32 %v47_v2, %v23_v5  ;;  %v32_v12 = vadd.f32 %v47_v2, %v24_v8  ;;  %v33_v13 = vadd.f32 %v47_v2, %v25_v9 }
   0x7   :  { %v34_v14 = vmax.f32 %v30_v10, 0.0  ;;  %v35_v15 = vmax.f32 %v31_v11, 0.0  ;;  %v36_v16 = vmax.f32 %v32_v12, 0.0  ;;  %v37_v17 = vmax.f32 %v33_v13, 0.0 }
   0x9   :  { %38 = vst [vmem:[%s101_s3] sm:$0xff] %v34_v14 }
   0xa   :  { %39 = vst [vmem:[%s101_s3 + $0x8] sm:$0xff] %v35_v15 }
   0xb   :  { %40 = vst [vmem:[%s101_s3 + $0x10] sm:$0xff] %v36_v16 }
   0xc   :  { %41 = vst [vmem:[%s101_s3 + $0x18] sm:$0xff] %v37_v17 }

// kernel: conv_bn_relu.2
= control target key start
LH: loop header
LB: loop body
LE: loop exit
PB: predicated region body
PF: predicated region fallthrough
CT: control target
= control target key end

     0   :  { %s254_s1 = inlined_call_operand.vmem [shape: f32[128,128], index: 1, kind: input, shape index: {}]   ;;  %s255_s0 = inlined_call_operand.vmem [shape: f32[32,128], index: 0, kind: input, shape index: {}]   ;;  %s256_s2 = inlined_call_operand.vmem [shape: f32[32,128], index: 2, kind: output, shape index: {0}]   ;;  %s257_s3 = inlined_call_operand.vmem [shape: f32[1,8,128], index: 3, kind: output, shape index: {1}]   ;;  %s258_s4 = inlined_call_operand.vmem [shape: f32[1,8,128], index: 4, kind: output, shape index: {2}]  }
   0x1   :  { %v33_v0 = vld [vmem:[%s254_s1 + $0x78] sm:$0xff]  ;;  %v32_v1 = vld [vmem:[%s254_s1 + $0x70] sm:$0xff]  ;;  %v31_v2 = vld [vmem:[%s254_s1 + $0x68] sm:$0xff] }
   0x2   :  { %104 = vmatpush.msra.mxu2 %v33_v0  ;;  %105 = vmatpush.msra.mxu3 %v33_v0  ;;  %v30_v3 = vld [vmem:[%s254_s1 + $0x60] sm:$0xff]  ;;  %v29_v4 = vld [vmem:[%s254_s1 + $0x58] sm:$0xff]  ;;  %v28_v5 = vld [vmem:[%s254_s1 + $0x50] sm:$0xff] }
   0x3   :  { %34 = vmatpush.msra.mxu0 %v33_v0  ;;  %103 = vmatpush.msra.mxu1 %v33_v0  ;;  %v27_v6 = vld [vmem:[%s254_s1 + $0x48] sm:$0xff]  ;;  %v26_v7 = vld [vmem:[%s254_s1 + $0x40] sm:$0xff]  ;;  %v25_v8 = vld [vmem:[%s254_s1 + $0x38] sm:$0xff] }
   0x4   :  { %107 = vmatpush.msra.mxu2 %v32_v1  ;;  %108 = vmatpush.msra.mxu3 %v32_v1  ;;  %v24_v9 = vld [vmem:[%s254_s1 + $0x30] sm:$0xff]  ;;  %v23_v10 = vld [vmem:[%s254_s1 + $0x28] sm:$0xff]  ;;  %v22_v11 = vld [vmem:[%s254_s1 + $0x20] sm:$0xff] }
   0x5   :  { %35 = vmatpush.msra.mxu0 %v32_v1  ;;  %106 = vmatpush.msra.mxu1 %v32_v1  ;;  %v21_v12 = vld [vmem:[%s254_s1 + $0x18] sm:$0xff]  ;;  %v20_v13 = vld [vmem:[%s254_s1 + $0x10] sm:$0xff]  ;;  %v19_v14 = vld [vmem:[%s254_s1 + $0x8] sm:$0xff] }
   0x6   :  { %110 = vmatpush.msra.mxu2 %v31_v2  ;;  %111 = vmatpush.msra.mxu3 %v31_v2  ;;  %v18_v15 = vld [vmem:[%s254_s1] sm:$0xff]  ;;  %v16_v16 = vld [vmem:[%s255_s0 + $0x10] sm:$0xff]  ;;  %v17_v17 = vld [vmem:[%s255_s0 + $0x18] sm:$0xff] }
   0x7   :  { %36 = vmatpush.msra.mxu0 %v31_v2  ;;  %109 = vmatpush.msra.mxu1 %v31_v2  ;;  %v14_v18 = vld [vmem:[%s255_s0] sm:$0xff]  ;;  %v15_v19 = vld [vmem:[%s255_s0 + $0x8] sm:$0xff] }
   0x8   :  { %113 = vmatpush.msra.mxu2 %v30_v3  ;;  %114 = vmatpush.msra.mxu3 %v30_v3 }
   0x9   :  { %37 = vmatpush.msra.mxu0 %v30_v3  ;;  %112 = vmatpush.msra.mxu1 %v30_v3 }
   0xa   :  { %116 = vmatpush.msra.mxu2 %v29_v4  ;;  %117 = vmatpush.msra.mxu3 %v29_v4 }
   0xb   :  { %38 = vmatpush.msra.mxu0 %v29_v4  ;;  %115 = vmatpush.msra.mxu1 %v29_v4 }
   0xc   :  { %119 = vmatpush.msra.mxu2 %v28_v5  ;;  %120 = vmatpush.msra.mxu3 %v28_v5 }
   0xd   :  { %39 = vmatpush.msra.mxu0 %v28_v5  ;;  %118 = vmatpush.msra.mxu1 %v28_v5 }
   0xe   :  { %122 = vmatpush.msra.mxu2 %v27_v6  ;;  %123 = vmatpush.msra.mxu3 %v27_v6 }
   0xf   :  { %40 = vmatpush.msra.mxu0 %v27_v6  ;;  %121 = vmatpush.msra.mxu1 %v27_v6 }
  0x10   :  { %125 = vmatpush.msra.mxu2 %v26_v7  ;;  %126 = vmatpush.msra.mxu3 %v26_v7 }
  0x11   :  { %41 = vmatpush.msra.mxu0 %v26_v7  ;;  %124 = vmatpush.msra.mxu1 %v26_v7 }
  0x12   :  { %128 = vmatpush.msra.mxu2 %v25_v8  ;;  %129 = vmatpush.msra.mxu3 %v25_v8 }
  0x13   :  { %42 = vmatpush.msra.mxu0 %v25_v8  ;;  %127 = vmatpush.msra.mxu1 %v25_v8 }
  0x14   :  { %131 = vmatpush.msra.mxu2 %v24_v9  ;;  %132 = vmatpush.msra.mxu3 %v24_v9 }
  0x15   :  { %43 = vmatpush.msra.mxu0 %v24_v9  ;;  %130 = vmatpush.msra.mxu1 %v24_v9 }
  0x16   :  { %134 = vmatpush.msra.mxu2 %v23_v10  ;;  %135 = vmatpush.msra.mxu3 %v23_v10 }
  0x17   :  { %44 = vmatpush.msra.mxu0 %v23_v10  ;;  %133 = vmatpush.msra.mxu1 %v23_v10 }
  0x18   :  { %137 = vmatpush.msra.mxu2 %v22_v11  ;;  %138 = vmatpush.msra.mxu3 %v22_v11 }
  0x19   :  { %45 = vmatpush.msra.mxu0 %v22_v11  ;;  %136 = vmatpush.msra.mxu1 %v22_v11 }
  0x1a   :  { %140 = vmatpush.msra.mxu2 %v21_v12  ;;  %141 = vmatpush.msra.mxu3 %v21_v12 }
  0x1b   :  { %46 = vmatpush.msra.mxu0 %v21_v12  ;;  %139 = vmatpush.msra.mxu1 %v21_v12 }
  0x1c   :  { %143 = vmatpush.msra.mxu2 %v20_v13  ;;  %144 = vmatpush.msra.mxu3 %v20_v13 }
  0x1d   :  { %47 = vmatpush.msra.mxu0 %v20_v13  ;;  %142 = vmatpush.msra.mxu1 %v20_v13 }
  0x1e   :  { %146 = vmatpush.msra.mxu2 %v19_v14  ;;  %147 = vmatpush.msra.mxu3 %v19_v14 }
  0x1f   :  { %48 = vmatpush.msra.mxu0 %v19_v14  ;;  %145 = vmatpush.msra.mxu1 %v19_v14 }
  0x20   :  { %149 = vmatpush.msra.mxu2 %v18_v15  ;;  %150 = vmatpush.msra.mxu3 %v18_v15 }
  0x21   :  { %56 = vmatmul.f32.vlgmr.msra.gmra.mxu2 %v16_v16  ;;  %59 = vmatmul.f32.vlgmr.msra.gmra.mxu3 %v17_v17 }
  0x22   :  { %49 = vmatpush.msra.mxu0 %v18_v15  ;;  %148 = vmatpush.msra.mxu1 %v18_v15 }
  0x23   :  { %50 = vmatmul.f32.vlgmr.msra.gmra.mxu0 %v14_v18  ;;  %53 = vmatmul.f32.vlgmr.msra.gmra.mxu1 %v15_v19 }
  0xa0   :  { %v51_v20 = vpop.f32.mrf.mxu0  ;;  %v54_v21 = vpop.f32.mrf.mxu1 }
  0xa1   :  { %63 = vst [vmem:[%s256_s2] sm:$0xff] %v51_v20  ;;  %v76_v22 = vmul.f32 %v51_v20, %v51_v20  ;;  %v67_v23 = vadd.f32 %v54_v21, %v51_v20  ;;  %v77_v24 = vmul.f32 %v54_v21, %v54_v21 }
  0xa2   :  { %64 = vst [vmem:[%s256_s2 + $0x8] sm:$0xff] %v54_v21 }
  0xa3   :  { %v80_v25 = vadd.f32 %v77_v24, %v76_v22 }
  0xa4   :  { %v57_v26 = vpop.f32.mrf.mxu2  ;;  %v60_v27 = vpop.f32.mrf.mxu3 }
  0xa5   :  { %65 = vst [vmem:[%s256_s2 + $0x10] sm:$0xff] %v57_v26  ;;  %v68_v28 = vadd.f32 %v67_v23, %v57_v26  ;;  %v78_v29 = vmul.f32 %v57_v26, %v57_v26  ;;  %v79_v30 = vmul.f32 %v60_v27, %v60_v27 }
  0xa6   :  { %66 = vst [vmem:[%s256_s2 + $0x18] sm:$0xff] %v60_v27 }
  0xa7   :  { %v81_v31 = vadd.f32 %v80_v25, %v78_v29  ;;  %v69_v32 = vadd.f32 %v68_v28, %v60_v27 }
  0xa9   :  { %v70_v33 = vrot.slane %v69_v32, 4  ;;  %v82_v34 = vadd.f32 %v81_v31, %v79_v30 }
  0xab   :  { %v71_v35 = vadd.f32 %v70_v33, %v69_v32  ;;  %v83_v36 = vrot.slane %v82_v34, 4 }
  0xad   :  { %v72_v37 = vrot.slane %v71_v35, 2  ;;  %v84_v38 = vadd.f32 %v83_v36, %v82_v34 }
  0xaf   :  { %v73_v39 = vadd.f32 %v72_v37, %v71_v35  ;;  %v85_v40 = vrot.slane %v84_v38, 2 }
  0xb1   :  { %v74_v41 = vrot.slane %v73_v39, 1  ;;  %v86_v42 = vadd.f32 %v85_v40, %v84_v38 }
  0xb3   :  { %v75_v43 = vadd.f32 %v74_v41, %v73_v39  ;;  %v87_v44 = vrot.slane %v86_v42, 1 }
  0xb5   :  { %v88_v45 = vadd.f32 %v87_v44, %v86_v42  ;;  %89 = vst [vmem:[%s257_s3] sm:$0xff] %v75_v43 }
  0xb7   :  { %90 = vst [vmem:[%s258_s4] sm:$0xff] %v88_v45 }

</bundles_post_ra>
